<compile_context>
chip_gen: v7x
topology: tpu7x:2x2x1
jax: 0.10.0
libtpu: 0.0.40
codegen_flags: <defaults>
</compile_context>

<pallas_src>
import numpy as np
import jax
import jax.numpy as jnp
from jax.experimental import pallas as pl
from jax.experimental.pallas import tpu as pltpu


# ----------------------------------------------------------------------------
# Kernel 1: softmax over classes + per-class |fg - p| errors, class-major.
# ----------------------------------------------------------------------------
def _softmax_errors_kernel(logits_ref, labels_ref, err_ref, fg_ref):
    """logits: (C, TN) f32, labels: (1, TN) i32 -> err (C, TN) f32, fg (C, TN) bf16."""
    x = logits_ref[...].astype(jnp.float32)            # (C, TN)
    lab = labels_ref[...]                               # (1, TN) int32
    C, TN = x.shape

    # softmax over the class (sublane) axis
    m = jnp.max(x, axis=0, keepdims=True)                # (1, TN)
    e = jnp.exp(x - m)
    p = e / jnp.sum(e, axis=0, keepdims=True)            # (C, TN)

    cls = jax.lax.broadcasted_iota(jnp.int32, (C, TN), 0)
    valid = lab != -1                                     # (1, TN)
    fg = jnp.where((lab == cls) & valid, 1.0, 0.0)        # (C, TN)
    err = jnp.where(valid, jnp.abs(fg - p), 0.0)          # invalid pixels -> 0

    err_ref[...] = err
    fg_ref[...] = fg.astype(fg_ref.dtype)                 # exact 0/1 in bf16


# ----------------------------------------------------------------------------
# Kernel 2: streamed Lovasz-grad scan over the sorted pixel axis.
# ----------------------------------------------------------------------------
def _lovasz_scan_kernel(err_ref, fg_ref, gts_ref, out_ref,
                        tri_ref, prefix_ref, loss_ref):
    """err/fg: (C, TN) sorted descending per class; gts: (C, 1) -> (1,1) loss."""
    i = pl.program_id(0)
    C, TN = err_ref.shape

    @pl.when(i == 0)
    def _init():
        row = jax.lax.broadcasted_iota(jnp.int32, (TN, TN), 0)
        col = jax.lax.broadcasted_iota(jnp.int32, (TN, TN), 1)
        tri_ref[...] = (row <= col).astype(jnp.float32)   # built once, persists
        prefix_ref[...] = jnp.zeros_like(prefix_ref)
        loss_ref[...] = jnp.zeros_like(loss_ref)

    err = err_ref[...]                                     # (C, TN) f32
    fg = fg_ref[...].astype(jnp.float32)                   # (C, TN)
    gts = gts_ref[...]                                     # (C, 1)

    # inclusive within-tile cumsum via MXU tri-matmul + carried prefix
    local_cum = jnp.dot(fg, tri_ref[...], preferred_element_type=jnp.float32)
    cum_in = prefix_ref[...] + local_cum                   # (C, TN)

    lane = jax.lax.broadcasted_iota(jnp.int32, (C, TN), 1)
    pos = (i * TN + lane + 1).astype(jnp.float32)          # global 1-indexed

    union = gts + pos - cum_in                             # cumsum(1-fg) = pos - cum
    jac = 1.0 - (gts - cum_in) / union                     # (C, TN)

    # jac at the previous position, in closed form (exclusive cumsum):
    cum_ex = cum_in - fg
    union_p = gts + (pos - 1.0) - cum_ex
    jac_prev = jnp.where(pos <= 1.0, 0.0,
                         1.0 - (gts - cum_ex) / jnp.maximum(union_p, 1e-9))
    grad = jac - jac_prev                                  # lovasz_grad

    loss_ref[...] += jnp.sum(grad * err, axis=-1, keepdims=True)   # (C, 1)
    prefix_ref[...] += jnp.sum(fg, axis=-1, keepdims=True)         # carry cumsum

    @pl.when(i == pl.num_programs(0) - 1)
    def _finalize():
        present = (gts > 0.0).astype(jnp.float32)          # (C, 1)
        cnt = jnp.sum(present, keepdims=True)              # (1, 1)
        total = jnp.sum(loss_ref[...] * present, keepdims=True)
        out_ref[...] = jnp.where(cnt > 0.0, total / jnp.maximum(cnt, 1.0), 0.0)


# ----------------------------------------------------------------------------
# Wrapper
# ----------------------------------------------------------------------------
def _round_up(a, b):
    return ((a + b - 1) // b) * b


def lovasz_softmax_loss(logits, labels, *, tile_n=2048, scan_tn=512):
    """logits: [B, C, H, W] float, labels: [B, H, W] int (-1 = ignore)."""
    B, C, H, W = logits.shape
    N = B * H * W

    # Kernel-1 pixel tile (lane axis); multiple of the kernel-2 scan tile.
    tile_n = _round_up(min(tile_n, _round_up(N, scan_tn)), scan_tn)
    N_pad = _round_up(N, tile_n)

    # class-major, lane-dense layout: (C, N) with pixels on lanes
    x_cm = jnp.transpose(logits, (1, 0, 2, 3)).reshape(C, N).astype(jnp.float32)
    lab_cm = labels.reshape(1, N).astype(jnp.int32)
    if N_pad != N:
        x_cm = jnp.pad(x_cm, ((0, 0), (0, N_pad - N)))
        lab_cm = jnp.pad(lab_cm, ((0, 0), (0, N_pad - N)), constant_values=-1)

    n_tiles1 = N_pad // tile_n
    errors, fg = pl.pallas_call(
        _softmax_errors_kernel,
        out_shape=(jax.ShapeDtypeStruct((C, N_pad), jnp.float32),
                   jax.ShapeDtypeStruct((C, N_pad), jnp.bfloat16)),
        grid=(n_tiles1,),
        in_specs=[pl.BlockSpec((C, tile_n), lambda i: (0, i)),
                  pl.BlockSpec((1, tile_n), lambda i: (0, i))],
        out_specs=(pl.BlockSpec((C, tile_n), lambda i: (0, i)),
                   pl.BlockSpec((C, tile_n), lambda i: (0, i))),
        compiler_params=pltpu.CompilerParams(
            dimension_semantics=("parallel",)),
    )(x_cm, lab_cm)

    # Per-class foreground counts (permutation invariant) from labels only.
    lab_flat = lab_cm[0]
    cls_ids = jnp.arange(C, dtype=jnp.int32)
    gts = jnp.sum((lab_flat[None, :] == cls_ids[:, None]).astype(jnp.float32),
                  axis=1, keepdims=True)                   # (C, 1); -1 never matches

    # TODO(synk): descending sort has no Pallas TPU primitive; done in XLA glue
    # along the contiguous last axis (class-major layout, no transposes).
    order = jnp.argsort(-errors, axis=-1)
    err_sorted = jnp.take_along_axis(errors, order, axis=-1)   # (C, N_pad) f32
    fg_sorted = jnp.take_along_axis(fg, order, axis=-1)        # (C, N_pad) bf16

    n_tiles2 = N_pad // scan_tn
    loss = pl.pallas_call(
        _lovasz_scan_kernel,
        out_shape=jax.ShapeDtypeStruct((1, 1), jnp.float32),
        grid=(n_tiles2,),
        in_specs=[pl.BlockSpec((C, scan_tn), lambda i: (0, i)),
                  pl.BlockSpec((C, scan_tn), lambda i: (0, i)),
                  pl.BlockSpec((C, 1), lambda i: (0, 0))],
        out_specs=pl.BlockSpec((1, 1), lambda i: (0, 0)),
        scratch_shapes=[pltpu.VMEM((scan_tn, scan_tn), jnp.float32),  # tri (once)
                        pltpu.VMEM((C, 1), jnp.float32),              # cumsum carry
                        pltpu.VMEM((C, 1), jnp.float32)],             # loss accum
        compiler_params=pltpu.CompilerParams(
            dimension_semantics=("arbitrary",)),
    )(err_sorted, fg_sorted, gts)
    return loss[0, 0]


# ----------------------------------------------------------------------------
# Reference (faithful numpy port of the PyTorch forward pass)
# ----------------------------------------------------------------------------
def _reference_numpy(logits, labels):
    logits = np.asarray(logits, np.float32)
    labels = np.asarray(labels)
    B, C, H, W = logits.shape
    x = logits.transpose(0, 2, 3, 1).reshape(-1, C)
    x = x - x.max(-1, keepdims=True)
    p = np.exp(x)
    p /= p.sum(-1, keepdims=True)
    lab = labels.reshape(-1)
    valid = lab != -1
    p = p[valid]
    lab = lab[valid]
    losses = []
    for c in range(C):
        if not (lab == c).any():
            continue
        fg = (lab == c).astype(np.float32)
        errors = np.abs(fg - p[:, c])
        perm = np.argsort(-errors, kind="stable")
        errors_sorted = errors[perm]
        fg_sorted = fg[perm]
        gts = fg_sorted.sum()
        inter = gts - fg_sorted.cumsum()
        union = gts + (1.0 - fg_sorted).cumsum()
        jac = 1.0 - inter / union
        jac[1:] = jac[1:] - jac[:-1]
        losses.append(float(jac @ errors_sorted))
    return float(np.mean(losses)) if losses else 0.0


if __name__ == "__main__":
    key = jax.random.PRNGKey(0)
    k1, k2, k3 = jax.random.split(key, 3)
    B, C, H, W = 2, 4, 16, 16
    logits = jax.random.normal(k1, (B, C, H, W), dtype=jnp.float32)
    labels = jax.random.randint(k2, (B, H, W), 0, C, dtype=jnp.int32)
    # sprinkle some ignore (-1) labels to exercise the valid-mask path
    labels = jnp.where(jax.random.bernoulli(k3, 0.1, (B, H, W)), -1, labels)

    loss = jax.block_until_ready(lovasz_softmax_loss(logits, labels))
    ref = _reference_numpy(np.asarray(logits), np.asarray(labels))
    assert np.isfinite(float(loss))
    assert abs(float(loss) - ref) < 5e-4, (float(loss), ref)
    print("KERNEL_OK")
</pallas_src>

<mosaic_0001>
module attributes {stable_mosaic.version = 11 : i64} {
  func.func @_softmax_errors_kernel(%arg0: i32, %arg1: memref<4x512xf32, #tpu.memory_space<vmem>>, %arg2: memref<1x512xi32, #tpu.memory_space<vmem>>, %arg3: memref<4x512xf32, #tpu.memory_space<vmem>>, %arg4: memref<4x512xbf16, #tpu.memory_space<vmem>>) attributes {dimension_semantics = [#tpu.dimension_semantics<parallel>], iteration_bounds = array<i64: 1>, scalar_prefetch = 0 : i64, scratch_operands = 0 : i64, tpu.core_type = #tpu.core_type<tc>, window_params = [{transform_indices = @transform_0, window_bounds = array<i64: 4, 512>}, {transform_indices = @transform_1, window_bounds = array<i64: 1, 512>}, {transform_indices = @transform_2, window_bounds = array<i64: 4, 512>}, {transform_indices = @transform_3, window_bounds = array<i64: 4, 512>}]} {
    %c0 = arith.constant 0 : index
    %c0_0 = arith.constant 0 : index
    %0 = vector.load %arg1[%c0, %c0_0] : memref<4x512xf32, #tpu.memory_space<vmem>>, vector<4x512xf32>
    %c0_1 = arith.constant 0 : index
    %c0_2 = arith.constant 0 : index
    %1 = vector.load %arg2[%c0_1, %c0_2] : memref<1x512xi32, #tpu.memory_space<vmem>>, vector<1x512xi32>
    %cst = arith.constant dense<0xFF800000> : vector<512xf32>
    %2 = vector.multi_reduction <maximumf>, %0, %cst [0] : vector<4x512xf32> to vector<512xf32>
    %3 = vector.shape_cast %2 : vector<512xf32> to vector<1x512xf32>
    %4 = vector.broadcast %3 : vector<1x512xf32> to vector<4x512xf32>
    %5 = arith.subf %0, %4 : vector<4x512xf32>
    %6 = math.exp %5 : vector<4x512xf32>
    %cst_3 = arith.constant dense<0.000000e+00> : vector<512xf32>
    %7 = vector.multi_reduction <add>, %6, %cst_3 [0] : vector<4x512xf32> to vector<512xf32>
    %8 = vector.shape_cast %7 : vector<512xf32> to vector<1x512xf32>
    %9 = vector.broadcast %8 : vector<1x512xf32> to vector<4x512xf32>
    %10 = arith.divf %6, %9 : vector<4x512xf32>
    %11 = tpu.iota {dimensions = array<i32: 0>} : vector<4x512xi32>
    %c-1_i32 = arith.constant -1 : i32
    %12 = vector.broadcast %c-1_i32 : i32 to vector<1x512xi32>
    %13 = arith.cmpi ne, %1, %12 : vector<1x512xi32>
    %14 = vector.broadcast %1 : vector<1x512xi32> to vector<4x512xi32>
    %15 = arith.cmpi eq, %14, %11 : vector<4x512xi32>
    %16 = vector.broadcast %13 : vector<1x512xi1> to vector<4x512xi1>
    %17 = arith.andi %15, %16 : vector<4x512xi1>
    %cst_4 = arith.constant 1.000000e+00 : f32
    %cst_5 = arith.constant 0.000000e+00 : f32
    %18 = vector.broadcast %cst_4 : f32 to vector<4x512xf32>
    %19 = vector.broadcast %cst_5 : f32 to vector<4x512xf32>
    %20 = arith.select %17, %18, %19 : vector<4x512xi1>, vector<4x512xf32>
    %21 = arith.subf %20, %10 : vector<4x512xf32>
    %22 = math.absf %21 : vector<4x512xf32>
    %cst_6 = arith.constant 0.000000e+00 : f32
    %23 = vector.shape_cast %13 : vector<1x512xi1> to vector<1x512xi1>
    %24 = vector.broadcast %23 : vector<1x512xi1> to vector<4x512xi1>
    %25 = vector.broadcast %cst_6 : f32 to vector<4x512xf32>
    %26 = arith.select %24, %22, %25 : vector<4x512xi1>, vector<4x512xf32>
    %c0_7 = arith.constant 0 : index
    %c0_8 = arith.constant 0 : index
    %27 = vector.load %arg3[%c0_7, %c0_8] : memref<4x512xf32, #tpu.memory_space<vmem>>, vector<4x512xf32>
    tpu.vector_store %arg3[%c0_7, %c0_8], %26 {strides = array<i32>} : memref<4x512xf32, #tpu.memory_space<vmem>>, vector<4x512xf32>,
    %28 = arith.truncf %20 : vector<4x512xf32> to vector<4x512xbf16>
    %c0_9 = arith.constant 0 : index
    %c0_10 = arith.constant 0 : index
    %29 = vector.load %arg4[%c0_9, %c0_10] : memref<4x512xbf16, #tpu.memory_space<vmem>>, vector<4x512xbf16>
    tpu.vector_store %arg4[%c0_9, %c0_10], %28 {strides = array<i32>} : memref<4x512xbf16, #tpu.memory_space<vmem>>, vector<4x512xbf16>,
    return
  }
  func.func @transform_0(%arg0: i32) -> (i32, i32) {
    %c0_i32 = arith.constant 0 : i32
    %c0_i32_0 = arith.constant 0 : i32
    return %c0_i32, %arg0 : i32, i32
  }
  func.func @transform_1(%arg0: i32) -> (i32, i32) {
    %c0_i32 = arith.constant 0 : i32
    %c0_i32_0 = arith.constant 0 : i32
    return %c0_i32, %arg0 : i32, i32
  }
  func.func @transform_2(%arg0: i32) -> (i32, i32) {
    %c0_i32 = arith.constant 0 : i32
    %c0_i32_0 = arith.constant 0 : i32
    return %c0_i32, %arg0 : i32, i32
  }
  func.func @transform_3(%arg0: i32) -> (i32, i32) {
    %c0_i32 = arith.constant 0 : i32
    %c0_i32_0 = arith.constant 0 : i32
    return %c0_i32, %arg0 : i32, i32
  }
}

</mosaic_0001>

<bundles_post_ra>
// kernel: tpu_custom_call.1
= control target key start
LH: loop header
LB: loop body
LE: loop exit
PB: predicated region body
PF: predicated region fallthrough
CT: control target
= control target key end

     0   :  { %9 = vsyncpa [#allocation3], 0  ;;  %s543_s0 = inlined_call_operand.hbm [shape: f32[4,512], index: 0, kind: input, shape index: {}]   ;;  %s544_s1 = inlined_call_operand.hbm [shape: s32[1,512], index: 1, kind: input, shape index: {}]   ;;  %s545_s2 = inlined_call_operand.hbm [shape: f32[4,512], index: 2, kind: output, shape index: {0}]   ;;  %s546_s3 = inlined_call_operand.hbm [shape: bf16[4,512], index: 3, kind: output, shape index: {1}]  }
   0x1   :  { %10 = vsyncpa [#allocation6], 0 }
   0x2   :  { %11 = vsyncpa [#allocation4], 0 }
   0x3   :  { %12 = vsyncpa [#allocation9], 0  ;;  %s389_s12 = smov [#allocation2]   ;;  %s390_s14 = smov [#allocation5]  }
   0x4   :  { %s19_s13 = sshll.u32 %s389_s12, 4  ;;  %s29_s15 = sshll.u32 %s390_s14, 4  ;;  %s20_s13 = int_to_ptr.vmem [resolvable:$true] %s19_s13  ;;  %s30_s15 = int_to_ptr.vmem [resolvable:$true] %s29_s15 }
   0x5   :  { %s293_s18 = scalar_lea.hbm %s543_s0, 256 }
   0x6   :  { %p294_p0 = scmp.ne.s32.totalorder %s543_s0, %s293_s18  ;;  %p297_p1 = scmp.lt.u32.totalorder %s293_s18, %s543_s0 }
   0x8   :  { %p299_p2 = pnand %p297_p1, %p294_p0 }
   0xa   :  { %302 = shalt.err (!%p299_p2)
}
   0xb   :  { %s303_s23 = scalar_lea.vmem %s20_s13, 256  ;;  %p308_p4 = scmp.lt.s32.totalorder %s20_s13, %s20_s13 }
   0xc   :  { %p304_p3 = scmp.ne.s32.totalorder %s20_s13, %s303_s23  ;;  %p309_p5 = scmp.lt.s32.totalorder %s303_s23, %s303_s23 }
   0xe   :  { %p310_p6 = por %p309_p5, %p308_p4 }
  0x10   :  { %p311_p7 = pnand %p310_p6, %p304_p3 }
  0x12   :  { %314 = shalt.err (!%p311_p7)
}
  0x13   :  { %22 = dma.hbm_to_vmem [thread:$0]  %s543_s0, 256, %s20_s13, [#allocation3]  }
  0x14   :  { %s315_s28 = scalar_lea.hbm %s544_s1, 64 }
  0x15   :  { %p316_p8 = scmp.ne.s32.totalorder %s544_s1, %s315_s28  ;;  %p319_p9 = scmp.lt.u32.totalorder %s315_s28, %s544_s1 }
  0x17   :  { %p321_p10 = pnand %p319_p9, %p316_p8 }
  0x19   :  { %324 = shalt.err (!%p321_p10)
}
  0x1a   :  { %s325_s6 = scalar_lea.vmem %s30_s15, 64  ;;  %p330_p12 = scmp.lt.s32.totalorder %s30_s15, %s30_s15 }
  0x1b   :  { %p326_p11 = scmp.ne.s32.totalorder %s30_s15, %s325_s6  ;;  %p331_p13 = scmp.lt.s32.totalorder %s325_s6, %s325_s6 }
  0x1d   :  { %p332_p0 = por %p331_p13, %p330_p12 }
  0x1f   :  { %p333_p1 = pnand %p332_p0, %p326_p11 }
  0x21   :  { %336 = shalt.err (!%p333_p1)
}
  0x22   :  { %32 = dma.hbm_to_vmem [thread:$0]  %s544_s1, 64, %s30_s15, [#allocation6]  }
  0x23   :  { %381 = dma.done.wait [#allocation3], 256  }
  0x24   :  { %382 = vsyncadd [#allocation3], 4294967040 }
  0x25   :  { %383 = dma.done.wait [#allocation6], 64  }
  0x26   :  { %384 = vsyncadd [#allocation6], 4294967232  ;;  %v137_v0 = vlaneseq  ;;  %v391_v2 = vmov 1983009808   ;;  %vm48_vm0 = vcmask 1043456   ;;  %v444_v7 = vld [vmem:[#allocation2] sm:$0xff] }
  0x27   :  { %v228_v3 = vunpack.c.l.s4 %v391_v2  ;;  %v41_v8 = vld [vmem:[#allocation5] sm:$0xf]  ;;  %v446_v9 = vld [vmem:[#allocation2 + $0x8] sm:$0xff]  ;;  %v44_v13 = vcombine.high %v444_v7, %v444_v7  ;;  %v49_v14 = vsel %vm48_vm0, %v444_v7, -inf  ;;  %v392_v18 = vmov 0   ;;  %s394_s1 = smov [#allocation8]  }
  0x28   :  { %v440_v1 = vshrl.u32 %v137_v0, 7  ;;  %vm139_vm1 = vcmp.ne.s32.totalorder %v41_v8, 4294967295  ;;  %v50_v16 = vrot.slane %v49_v14, 4  ;;  %v45_v20 = vcombine.high %v446_v9, %v446_v9  ;;  %s260_s8 = sshll.u32 %s394_s1, 4  ;;  %s261_s8 = int_to_ptr.vmem [resolvable:$true] %s260_s8 }
  0x29   :  { %v229_v6 = vunpack.c.0.s8 %v228_v3  ;;  %v160_v19 = vsel %vm139_vm1, 1, %v392_v18  ;;  %v56_v21 = vsel %vm48_vm0, %v44_v13, -inf  ;;  %v63_v26 = vsel %vm48_vm0, %v446_v9, -inf  ;;  %s337_s9 = scalar_lea.vmem %s261_s8, 128  ;;  %p342_p3 = scmp.lt.s32.totalorder %s261_s8, %s261_s8 }
  0x2a   :  { %v142_v4 = vsub.s32 0, %v440_v1  ;;  %v146_v5 = vsub.s32 1, %v440_v1  ;;  %v150_v10 = vsub.s32 2, %v440_v1  ;;  %v154_v11 = vsub.s32 3, %v440_v1  ;;  %p338_p2 = scmp.ne.s32.totalorder %s261_s8, %s337_s9  ;;  %p343_p4 = scmp.lt.s32.totalorder %s337_s9, %s337_s9 }
  0x2b   :  { %v451_v12 = vsub.s32 %v229_v6, %v440_v1  ;;  %v51_v24 = vmax.f32 %v49_v14, %v50_v16  ;;  %v57_v25 = vrot.slane %v56_v21, 4  ;;  %v64_v27 = vrot.slane %v63_v26, 4 }
  0x2c   :  { %v143_v15 = vrot.slane %v41_v8, %v142_v4  ;;  %v147_v17 = vrot.slane %v41_v8, %v146_v5  ;;  %v461_v22 = vrot.slane %v160_v19, %v142_v4  ;;  %v463_v23 = vrot.slane %v160_v19, %v146_v5  ;;  %p344_p5 = por %p343_p4, %p342_p3 }
  0x2d   :  { %v70_v28 = vsel %vm48_vm0, %v45_v20, -inf  ;;  %v52_v29 = vrot.slane %v51_v24, 2  ;;  %v58_v30 = vmax.f32 %v56_v21, %v57_v25  ;;  %v151_v32 = vrot.slane %v41_v8, %v150_v10 }
  0x2e   :  { %vm156_vm2 = vcmp.eq.s32.totalorder %v143_v15, %v440_v1  ;;  %vm157_vm3 = vcmp.eq.s32.totalorder %v147_v17, %v440_v1  ;;  %vm177_vm4 = vcmp.eq.s32.totalorder %v461_v22, 1  ;;  %vm178_vm5 = vcmp.eq.s32.totalorder %v463_v23, 1  ;;  %p345_p6 = pnand %p344_p5, %p338_p2 }
  0x2f   :  { %vm181_vm6 = vmand %vm156_vm2, %vm177_vm4  ;;  %v71_v31 = vrot.slane %v70_v28, 4  ;;  %v393_v33 = vmov 0.0   ;;  %v65_v35 = vmax.f32 %v63_v26, %v64_v27  ;;  %v155_v36 = vrot.slane %v41_v8, %v154_v11 }
  0x30   :  { %vm182_vm7 = vmand %vm157_vm3, %vm178_vm5  ;;  %v475_v34 = vsel %vm181_vm6, 1.0, %v393_v33  ;;  %v477_v37 = vrot.slane %v160_v19, %v150_v10  ;;  %v53_v38 = vmax.f32 %v51_v24, %v52_v29  ;;  %v59_v39 = vrot.slane %v58_v30, 2 }
  0x31   :  { %v479_v40 = vsel %vm182_vm7, 1.0, %v393_v33  ;;  %v72_v41 = vmax.f32 %v70_v28, %v71_v31  ;;  %v66_v42 = vrot.slane %v65_v35, 2  ;;  %vm158_vm8 = vcmp.eq.s32.totalorder %v151_v32, %v440_v1 }
  0x32   :  { %vm159_vm9 = vcmp.eq.s32.totalorder %v155_v36, %v440_v1  ;;  %v483_v43 = vrot.slane %v160_v19, %v154_v11  ;;  %v54_v44 = vrot.slane %v53_v38, 1  ;;  %v60_v45 = vmax.f32 %v58_v30, %v59_v39 }
  0x33   :  { %v73_v46 = vrot.slane %v72_v41, 2  ;;  %vm179_vm10 = vcmp.eq.s32.totalorder %v477_v37, 1  ;;  %v67_v47 = vmax.f32 %v65_v35, %v66_v42  ;;  %v274_v48 = vpack.c.bf16 %v479_v40, %v475_v34 }
  0x34   :  { %vm180_vm11 = vcmp.eq.s32.totalorder %v483_v43, 1  ;;  %vm183_vm12 = vmand %vm158_vm8, %vm179_vm10  ;;  %v55_v49 = vmax.f32 %v53_v38, %v54_v44  ;;  %v61_v50 = vrot.slane %v60_v45, 1 }
  0x35   :  { %v74_v51 = vmax.f32 %v72_v41, %v73_v46  ;;  %vm184_vm13 = vmand %vm159_vm9, %vm180_vm11  ;;  %v493_v52 = vsel %vm183_vm12, 1.0, %v393_v33  ;;  %v68_v53 = vrot.slane %v67_v47, 1  ;;  %v233_v58 = vrot.slane %v274_v48, %v451_v12 }
  0x36   :  { %v495_v54 = vsel %vm184_vm13, 1.0, %v393_v33  ;;  %v62_v55 = vmax.f32 %v60_v45, %v61_v50 }
  0x37   :  { %v75_v56 = vrot.slane %v74_v51, 1  ;;  %v275_v57 = vpack.c.bf16 %v495_v54, %v493_v52  ;;  %v69_v59 = vmax.f32 %v67_v47, %v68_v53 }
  0x38   :  { %v81_v60 = vcombine.low %v55_v49, %v62_v55 }
  0x39   :  { %v76_v61 = vmax.f32 %v74_v51, %v75_v56  ;;  %v240_v62 = vrot.slane %v275_v57, %v451_v12 }
  0x3a   :  { %v85_v63 = vsub.f32 %v444_v7, %v81_v60 }
  0x3b   :  { %v82_v0 = vcombine.low %v69_v59, %v76_v61  ;;  %v241_v1 = vcombine.low %v233_v58, %v240_v62 }
  0x3c   :  { %v87_v2 = vmul.f32 1.442695, %v85_v63 }
  0x3d   :  { %v86_v3 = vsub.f32 %v446_v9, %v82_v0  ;;  %243 = vst [vmem:[#allocation8] sm:$0xff] %v241_v1 }
  0x3e   :  { %348 = shalt.err (!%p345_p6)
}
  0x3f   :  { %s349_s12 = scalar_lea.hbm %s546_s3, 128 }
  0x40   :  { %p350_p7 = scmp.ne.s32.totalorder %s546_s3, %s349_s12  ;;  %p353_p8 = scmp.lt.u32.totalorder %s349_s12, %s546_s3 }
  0x42   :  { %p355_p9 = pnand %p353_p8, %p350_p7 }
  0x44   :  { %358 = shalt.err (!%p355_p9)
}
  0x45   :  { %263 = dma.vmem_to_hbm [thread:$0]  %s261_s8, 128, %s546_s3, [#allocation9]   ;;  %285 = vpow2.f32 %v87_v2  ;;  %v89_v4 = vmul.f32 1.442695, %v86_v3 }
  0x46   :  { %s395_s3 = smov [#allocation7]  }
  0x47   :  { %287 = vpow2.f32 %v89_v4  ;;  %s250_s19 = sshll.u32 %s395_s3, 4  ;;  %s251_s19 = int_to_ptr.vmem [resolvable:$true] %s250_s19 }
  0x48   :  { %s359_s20 = scalar_lea.vmem %s251_s19, 256  ;;  %p364_p11 = scmp.lt.s32.totalorder %s251_s19, %s251_s19 }
  0x49   :  { %p360_p10 = scmp.ne.s32.totalorder %s251_s19, %s359_s20  ;;  %p365_p12 = scmp.lt.s32.totalorder %s359_s20, %s359_s20 }
  0x4b   :  { %p366_p13 = por %p365_p12, %p364_p11 }
  0x4d   :  { %p367_p0 = pnand %p366_p13, %p360_p10 }
  0x4f   :  { %v286_v5 = vpop.eup %285 }
  0x50   :  { %v93_v6 = vcombine.high %v286_v5, %v286_v5  ;;  %v97_v7 = vsel %vm48_vm0, %v286_v5, 0.0 }
  0x51   :  { %v288_v8 = vpop.eup %287  ;;  %v98_v9 = vrot.slane %v97_v7, 4 }
  0x52   :  { %v104_v10 = vsel %vm48_vm0, %v93_v6, 0.0  ;;  %v94_v11 = vcombine.high %v288_v8, %v288_v8  ;;  %v111_v12 = vsel %vm48_vm0, %v288_v8, 0.0 }
  0x53   :  { %v99_v13 = vadd.f32 %v98_v9, %v97_v7  ;;  %v105_v14 = vrot.slane %v104_v10, 4  ;;  %v112_v15 = vrot.slane %v111_v12, 4 }
  0x54   :  { %v118_v16 = vsel %vm48_vm0, %v94_v11, 0.0 }
  0x55   :  { %v100_v17 = vrot.slane %v99_v13, 2  ;;  %v106_v18 = vadd.f32 %v105_v14, %v104_v10  ;;  %v113_v19 = vadd.f32 %v112_v15, %v111_v12  ;;  %v119_v20 = vrot.slane %v118_v16, 4 }
  0x57   :  { %v101_v21 = vadd.f32 %v100_v17, %v99_v13  ;;  %v107_v24 = vrot.slane %v106_v18, 2  ;;  %v114_v25 = vrot.slane %v113_v19, 2  ;;  %v120_v26 = vadd.f32 %v119_v20, %v118_v16 }
  0x59   :  { %v102_v27 = vrot.slane %v101_v21, 1  ;;  %v108_v28 = vadd.f32 %v107_v24, %v106_v18  ;;  %v115_v29 = vadd.f32 %v114_v25, %v113_v19  ;;  %v121_v30 = vrot.slane %v120_v26, 2 }
  0x5b   :  { %v103_v31 = vadd.f32 %v102_v27, %v101_v21  ;;  %v109_v32 = vrot.slane %v108_v28, 1  ;;  %v116_v33 = vrot.slane %v115_v29, 1  ;;  %v122_v35 = vadd.f32 %v121_v30, %v120_v26 }
  0x5d   :  { %v110_v36 = vadd.f32 %v109_v32, %v108_v28  ;;  %v117_v38 = vadd.f32 %v116_v33, %v115_v29  ;;  %v123_v39 = vrot.slane %v122_v35, 1 }
  0x5f   :  { %v129_v41 = vcombine.low %v103_v31, %v110_v36  ;;  %v124_v42 = vadd.f32 %v123_v39, %v122_v35 }
  0x61   :  { %289 = vrcp.f32 %v129_v41  ;;  %v130_v44 = vcombine.low %v117_v38, %v124_v42 }
  0x63   :  { %291 = vrcp.f32 %v130_v44 }
  0x6b   :  { %v290_v45 = vpop.eup %289 }
  0x6c   :  { %v134_v46 = vmul.f32 %v290_v45, %v286_v5 }
  0x6d   :  { %v292_v47 = vpop.eup %291 }
  0x6e   :  { %v191_v48 = vcombine.high %v134_v46, %v134_v46  ;;  %v195_v49 = vsub.f32 %v475_v34, %v134_v46  ;;  %v136_v50 = vmul.f32 %v292_v47, %v288_v8 }
  0x70   :  { %v196_v51 = vsub.f32 %v479_v40, %v191_v48  ;;  %v199_v53 = vand.u32 2147483647, %v195_v49  ;;  %v192_v55 = vcombine.high %v136_v50, %v136_v50  ;;  %v197_v56 = vsub.f32 %v493_v52, %v136_v50 }
  0x72   :  { %v200_v57 = vand.u32 2147483647, %v196_v51  ;;  %v203_v58 = vsel %vm177_vm4, %v199_v53, 0.0  ;;  %v198_v59 = vsub.f32 %v495_v54, %v192_v55  ;;  %v201_v60 = vand.u32 2147483647, %v197_v56 }
  0x74   :  { %v204_v61 = vsel %vm178_vm5, %v200_v57, 0.0  ;;  %v202_v62 = vand.u32 2147483647, %v198_v59  ;;  %v205_v34 = vsel %vm179_vm10, %v201_v60, 0.0 }
  0x75   :  { %v211_v40 = vcombine.low %v203_v58, %v204_v61 }
  0x76   :  { %v206_v52 = vsel %vm180_vm11, %v202_v62, 0.0 }
  0x77   :  { %215 = vst [vmem:[#allocation7] sm:$0xff] %v211_v40  ;;  %v212_v63 = vcombine.low %v205_v34, %v206_v52 }
  0x79   :  { %216 = vst [vmem:[#allocation7 + $0x8] sm:$0xff] %v212_v63 }
  0x7a   :  { %370 = shalt.err (!%p367_p0)
}
  0x7b   :  { %s371_s23 = scalar_lea.hbm %s545_s2, 256 }
  0x7c   :  { %p372_p1 = scmp.ne.s32.totalorder %s545_s2, %s371_s23  ;;  %p375_p2 = scmp.lt.u32.totalorder %s371_s23, %s545_s2 }
  0x7e   :  { %p377_p3 = pnand %p375_p2, %p372_p1 }
  0x80   :  { %380 = shalt.err (!%p377_p3)
}
  0x81   :  { %253 = dma.vmem_to_hbm [thread:$0]  %s251_s19, 256, %s545_s2, [#allocation4]  }
  0x82   :  { %385 = dma.done.wait [#allocation4], 256  }
  0x83   :  { %386 = vsyncadd [#allocation4], 4294967040 }
  0x84   :  { %387 = dma.done.wait [#allocation9], 128  }
  0x85   :  { %388 = vsyncadd [#allocation9], 4294967168 }
  0x86   :  { %270 = vsyncpa [#allocation3], 1 }
  0x87   :  { %271 = vsyncpa [#allocation6], 1 }
  0x88   :  { %272 = vsyncpa [#allocation4], 1 }
  0x89   :  { %273 = vsyncpa [#allocation9], 1 }

</bundles_post_ra>
